<compile_context>
chip_gen: v6e
topology: v6e:2x2x1
jax: 0.10.0
libtpu: 0.0.40
codegen_flags: <defaults>
</compile_context>

<pallas_src>
import jax
import jax.numpy as jnp
from jax.experimental import pallas as pl
from jax.experimental.pallas import tpu as pltpu

KSIZE = 3            # kernel_size
DILATION = 1         # dilation
IS_MP = True         # exercise the mp (bottleneck 1x1-conv) branch
LEAKY_SLOPE = 0.01   # F.leaky_relu default
LN_EPS = 1e-8        # matches nn.LayerNorm(out_channel, eps=1e-08)


def _round_up(n, m):
    return (n + m - 1) // m * m


# ---------------- the Pallas kernel (factory closes over static shape info) --------

def _make_kernel(BT, L, CP, C_true, ksize, dilation, pad_rows, is_mp):
    KCP = ksize * CP
    inv_c = 1.0 / C_true

    def kernel(x_ref,
               wc1_ref, b1_ref, g1_ref, be1_ref,
               wc2_ref, b2_ref, g2_ref, be2_ref,
               mpw1_ref, mpb1_ref, mpw2_ref, mpb2_ref,
               o_ref, pad_ref):
        # Fold batch into the matmul M dimension (L is a sublane multiple, so this
        # reshape is layout preserving).
        xf = x_ref[...].astype(jnp.float32).reshape(BT * L, CP)

        # Channel mask (true channels only); hoisted, reused by both LayerNorms.
        ch_mask = jax.lax.broadcasted_iota(jnp.int32, (BT * L, CP), 1) < C_true

        # Zero the causal-padding rows of the scratch (rows [0, pad_rows) per batch);
        # data rows get overwritten below, the pad rows are never written again.
        pad_ref[:, :pad_rows, :] = jnp.zeros((BT, pad_rows, KCP), jnp.float32)

        def causal_conv(v2d, wcat_ref, bias_ref, dil):
            # One fused matmul for all K taps, then zero-copy causal shifts of the
            # K column-slices via static slices of the zero-padded scratch.
            y = jnp.dot(v2d, wcat_ref[...], preferred_element_type=jnp.float32)
            pad_ref[:, pad_rows:, :] = y.reshape(BT, L, KCP)
            acc = None
            for j in range(ksize):
                off = (ksize - 1 - j) * dil          # causal look-back of tap j
                tap = pad_ref[:, pad_rows - off: pad_rows - off + L,
                              j * CP:(j + 1) * CP]
                acc = tap if acc is None else acc + tap
            # bias added once (not broadcast into the accumulator init)
            return acc.reshape(BT * L, CP) + bias_ref[...]

        if is_mp:
            # mp weights loaded once, shared by both mp() applications.
            mpw1 = mpw1_ref[...]
            mpb1 = mpb1_ref[...]
            mpw2 = mpw2_ref[...]
            mpb2 = mpb2_ref[...]

            def mp_fn(v):
                h = jnp.dot(v, mpw1, preferred_element_type=jnp.float32) + mpb1
                h = jnp.where(h > 0, h, LEAKY_SLOPE * h)
                return jnp.dot(h, mpw2, preferred_element_type=jnp.float32) + mpb2

        def layer_norm(v, gamma, beta):
            # Padded lanes of v are exactly 0, so sums over CP lanes == sums over C.
            mean = jnp.sum(v, axis=-1, keepdims=True) * inv_c
            xc = jnp.where(ch_mask, v - mean, 0.0)
            var = jnp.sum(xc * xc, axis=-1, keepdims=True) * inv_c
            # gamma/beta are zero on padded lanes -> padded lanes stay exactly 0.
            return xc * jax.lax.rsqrt(var + LN_EPS) * gamma + beta

        # ---- conv1 (causal, dilation d) [+ mp(x)] -> relu(ln1) ----
        out = causal_conv(xf, wc1_ref, b1_ref, dilation)
        if is_mp:
            out = out + mp_fn(xf)
        out = jnp.maximum(layer_norm(out, g1_ref[...], be1_ref[...]), 0.0)

        # ---- conv2 (causal, dilation 2d) [+ mp(out)] -> relu(ln2) ----
        out2 = causal_conv(out, wc2_ref, b2_ref, dilation * 2)
        if is_mp:
            out2 = out2 + mp_fn(out)
        out2 = jnp.maximum(layer_norm(out2, g2_ref[...], be2_ref[...]), 0.0)

        # residual connection
        o_ref[...] = (out2 + xf).reshape(BT, L, CP).astype(o_ref.dtype)

    return kernel


# ---------------- wrapper: lane-padding + fused conv weights + pallas_call ---------

def residual_block(x, params, *, kernel_size=KSIZE, dilation=DILATION, is_mp=IS_MP):
    B, L, C = x.shape
    (w1, b1, g1, be1, w2, b2, g2, be2, mpw1, mpb1, mpw2, mpb2) = params
    H = mpw1.shape[1]

    CP = _round_up(C, 128)                      # lane-dense channel width
    HP = _round_up(H, 128)                      # lane-dense mp bottleneck width
    max_off = (kernel_size - 1) * dilation * 2  # largest causal look-back (conv2)
    pad_rows = _round_up(max(max_off, 1), 8)    # sublane-aligned causal zero pad

    BT = B                                      # fold whole batch into matmul M
    assert B % BT == 0 and L % 8 == 0

    def pad2(a, r, c):
        return jnp.pad(a, ((0, r - a.shape[0]), (0, c - a.shape[1])))

    # conv weights stored (K, Cin, Cout) (i.e. PyTorch (Cout,Cin,1,K) transposed):
    # zero-pad channels, then concatenate the K taps along columns -> (CP, K*CP).
    def wcat(w):
        wp = jnp.pad(w, ((0, 0), (0, CP - C), (0, CP - C)))
        return jnp.concatenate([wp[j] for j in range(kernel_size)], axis=1)

    wc1, wc2 = wcat(w1), wcat(w2)
    b1p, g1p, be1p = pad2(b1, 1, CP), pad2(g1, 1, CP), pad2(be1, 1, CP)
    b2p, g2p, be2p = pad2(b2, 1, CP), pad2(g2, 1, CP), pad2(be2, 1, CP)
    mpw1p, mpb1p = pad2(mpw1, CP, HP), pad2(mpb1, 1, HP)
    mpw2p, mpb2p = pad2(mpw2, HP, CP), pad2(mpb2, 1, CP)
    xp = jnp.pad(x, ((0, 0), (0, 0), (0, CP - C)))

    kernel = _make_kernel(BT, L, CP, C, kernel_size, dilation, pad_rows, is_mp)

    def full_spec(shape):
        return pl.BlockSpec(shape, lambda i: (0,) * len(shape))

    out = pl.pallas_call(
        kernel,
        out_shape=jax.ShapeDtypeStruct((B, L, CP), x.dtype),
        grid_spec=pltpu.PrefetchScalarGridSpec(
            num_scalar_prefetch=0,
            grid=(B // BT,),
            in_specs=[
                pl.BlockSpec((BT, L, CP), lambda i: (i, 0, 0)),          # x
                full_spec((CP, kernel_size * CP)), full_spec((1, CP)),   # conv1 Wcat, b
                full_spec((1, CP)), full_spec((1, CP)),                  # ln1 gamma, beta
                full_spec((CP, kernel_size * CP)), full_spec((1, CP)),   # conv2 Wcat, b
                full_spec((1, CP)), full_spec((1, CP)),                  # ln2 gamma, beta
                full_spec((CP, HP)), full_spec((1, HP)),                 # mp conv1 w, b
                full_spec((HP, CP)), full_spec((1, CP)),                 # mp conv2 w, b
            ],
            out_specs=pl.BlockSpec((BT, L, CP), lambda i: (i, 0, 0)),
            scratch_shapes=[
                pltpu.VMEM((BT, pad_rows + L, kernel_size * CP), jnp.float32)],
        ),
        compiler_params=pltpu.CompilerParams(
            dimension_semantics=("parallel",),
            vmem_limit_bytes=32 * 1024 * 1024),
    )(xp, wc1, b1p, g1p, be1p, wc2, b2p, g2p, be2p, mpw1p, mpb1p, mpw2p, mpb2p)

    return out[..., :C]


# ---------------- pure-JAX reference (same math, unpadded, for verification) -------

def reference(x, params):
    (w1, b1, g1, be1, w2, b2, g2, be2, mpw1, mpb1, mpw2, mpb2) = params
    B, L, C = x.shape

    def conv(inp, w, b, dil):
        acc = jnp.broadcast_to(b, (B, L, w.shape[2]))
        for j in range(KSIZE):
            off = (KSIZE - 1 - j) * dil
            if off == 0:
                shifted = inp
            else:
                shifted = jnp.concatenate(
                    [jnp.zeros((B, off, C), inp.dtype), inp[:, : L - off, :]], axis=1)
            acc = acc + jnp.einsum("blc,cd->bld", shifted, w[j])
        return acc

    def ln(v, g, be):
        m = jnp.mean(v, -1, keepdims=True)
        var = jnp.mean((v - m) ** 2, -1, keepdims=True)
        return (v - m) * jax.lax.rsqrt(var + LN_EPS) * g + be

    def mpf(v):
        h = v @ mpw1 + mpb1
        h = jnp.where(h > 0, h, LEAKY_SLOPE * h)
        return h @ mpw2 + mpb2

    out = conv(x, w1, b1, DILATION)
    if IS_MP:
        out = out + mpf(x)
    out = jnp.maximum(ln(out, g1, be1), 0.0)
    out2 = conv(out, w2, b2, DILATION * 2)
    if IS_MP:
        out2 = out2 + mpf(out)
    out2 = jnp.maximum(ln(out2, g2, be2), 0.0)
    return out2 + x


# ---------------- driver ----------------

if __name__ == "__main__":
    B, L, C = 2, 8, 32      # batch, seq_len, in_channel == out_channel
    H = C // 4

    key = jax.random.PRNGKey(0)
    ks = jax.random.split(key, 16)
    dt = jnp.float32

    x = jax.random.normal(ks[0], (B, L, C), dt)

    # deterministic synthetic parameters (PyTorch conv weights (Cout,Cin,1,K) are kept
    # here directly in the transposed (K, Cin, Cout) layout used by the kernel)
    w1 = 0.1 * jax.random.normal(ks[1], (KSIZE, C, C), dt)
    b1 = 0.1 * jax.random.normal(ks[2], (1, C), dt)
    g1 = jnp.ones((1, C), dt) + 0.05 * jax.random.normal(ks[3], (1, C), dt)
    be1 = 0.05 * jax.random.normal(ks[4], (1, C), dt)
    w2 = 0.1 * jax.random.normal(ks[5], (KSIZE, C, C), dt)
    b2 = 0.1 * jax.random.normal(ks[6], (1, C), dt)
    g2 = jnp.ones((1, C), dt) + 0.05 * jax.random.normal(ks[7], (1, C), dt)
    be2 = 0.05 * jax.random.normal(ks[8], (1, C), dt)
    mpw1 = 0.1 * jax.random.normal(ks[9], (C, H), dt)
    mpb1 = 0.1 * jax.random.normal(ks[10], (1, H), dt)
    mpw2 = 0.1 * jax.random.normal(ks[11], (H, C), dt)
    mpb2 = 0.1 * jax.random.normal(ks[12], (1, C), dt)

    params = (w1, b1, g1, be1, w2, b2, g2, be2, mpw1, mpb1, mpw2, mpb2)

    out = residual_block(x, params)
    out = jax.block_until_ready(out)

    ref = jax.block_until_ready(reference(x, params))
    assert out.shape == (B, L, C)
    assert jnp.allclose(out, ref, atol=5e-5, rtol=5e-5), "mismatch vs reference"

    print("KERNEL_OK")
</pallas_src>

<mosaic_0001>
module attributes {stable_mosaic.version = 11 : i64} {
  func.func @kernel(%arg0: i32, %arg1: memref<2x8x128xf32, #tpu.memory_space<vmem>>, %arg2: memref<128x384xf32, #tpu.memory_space<vmem>>, %arg3: memref<1x128xf32, #tpu.memory_space<vmem>>, %arg4: memref<1x128xf32, #tpu.memory_space<vmem>>, %arg5: memref<1x128xf32, #tpu.memory_space<vmem>>, %arg6: memref<128x384xf32, #tpu.memory_space<vmem>>, %arg7: memref<1x128xf32, #tpu.memory_space<vmem>>, %arg8: memref<1x128xf32, #tpu.memory_space<vmem>>, %arg9: memref<1x128xf32, #tpu.memory_space<vmem>>, %arg10: memref<128x128xf32, #tpu.memory_space<vmem>>, %arg11: memref<1x128xf32, #tpu.memory_space<vmem>>, %arg12: memref<128x128xf32, #tpu.memory_space<vmem>>, %arg13: memref<1x128xf32, #tpu.memory_space<vmem>>, %arg14: memref<2x8x128xf32, #tpu.memory_space<vmem>>, %arg15: memref<2x16x384xf32, #tpu.memory_space<vmem>>) attributes {dimension_semantics = [#tpu.dimension_semantics<parallel>], iteration_bounds = array<i64: 1>, scalar_prefetch = 0 : i64, scratch_operands = 1 : i64, tpu.core_type = #tpu.core_type<tc>, window_params = [{transform_indices = @transform_0, window_bounds = array<i64: 2, 8, 128>}, {pipeline_mode = #tpu.pipeline_mode<synchronous>, transform_indices = @transform_1, window_bounds = array<i64: 128, 384>}, {pipeline_mode = #tpu.pipeline_mode<synchronous>, transform_indices = @transform_2, window_bounds = array<i64: 1, 128>}, {pipeline_mode = #tpu.pipeline_mode<synchronous>, transform_indices = @transform_3, window_bounds = array<i64: 1, 128>}, {pipeline_mode = #tpu.pipeline_mode<synchronous>, transform_indices = @transform_4, window_bounds = array<i64: 1, 128>}, {pipeline_mode = #tpu.pipeline_mode<synchronous>, transform_indices = @transform_5, window_bounds = array<i64: 128, 384>}, {pipeline_mode = #tpu.pipeline_mode<synchronous>, transform_indices = @transform_6, window_bounds = array<i64: 1, 128>}, {pipeline_mode = #tpu.pipeline_mode<synchronous>, transform_indices = @transform_7, window_bounds = array<i64: 1, 128>}, {pipeline_mode = #tpu.pipeline_mode<synchronous>, transform_indices = @transform_8, window_bounds = array<i64: 1, 128>}, {pipeline_mode = #tpu.pipeline_mode<synchronous>, transform_indices = @transform_9, window_bounds = array<i64: 128, 128>}, {pipeline_mode = #tpu.pipeline_mode<synchronous>, transform_indices = @transform_10, window_bounds = array<i64: 1, 128>}, {pipeline_mode = #tpu.pipeline_mode<synchronous>, transform_indices = @transform_11, window_bounds = array<i64: 128, 128>}, {pipeline_mode = #tpu.pipeline_mode<synchronous>, transform_indices = @transform_12, window_bounds = array<i64: 1, 128>}, {transform_indices = @transform_13, window_bounds = array<i64: 2, 8, 128>}]} {
    %c0 = arith.constant 0 : index
    %c0_0 = arith.constant 0 : index
    %c0_1 = arith.constant 0 : index
    %0 = vector.load %arg1[%c0, %c0_0, %c0_1] : memref<2x8x128xf32, #tpu.memory_space<vmem>>, vector<2x8x128xf32>
    %1 = vector.shape_cast %0 : vector<2x8x128xf32> to vector<16x128xf32>
    %2 = tpu.iota {dimensions = array<i32: 1>} : vector<16x128xi32>
    %c32_i32 = arith.constant 32 : i32
    %3 = vector.broadcast %c32_i32 : i32 to vector<16x128xi32>
    %4 = arith.cmpi slt, %2, %3 : vector<16x128xi32>
    %cst = arith.constant 0.000000e+00 : f32
    %5 = vector.broadcast %cst : f32 to vector<2x8x384xf32>
    %c0_2 = arith.constant 0 : index
    %c0_3 = arith.constant 0 : index
    %c0_4 = arith.constant 0 : index
    %6 = vector.load %arg15[%c0_2, %c0_3, %c0_4] : memref<2x16x384xf32, #tpu.memory_space<vmem>>, vector<2x8x384xf32>
    tpu.vector_store %arg15[%c0_2, %c0_3, %c0_4], %5 {strides = array<i32>} : memref<2x16x384xf32, #tpu.memory_space<vmem>>, vector<2x8x384xf32>,
    %c0_5 = arith.constant 0 : index
    %c0_6 = arith.constant 0 : index
    %7 = vector.load %arg10[%c0_5, %c0_6] : memref<128x128xf32, #tpu.memory_space<vmem>>, vector<128x128xf32>
    %c0_7 = arith.constant 0 : index
    %c0_8 = arith.constant 0 : index
    %8 = vector.load %arg11[%c0_7, %c0_8] : memref<1x128xf32, #tpu.memory_space<vmem>>, vector<1x128xf32>
    %c0_9 = arith.constant 0 : index
    %c0_10 = arith.constant 0 : index
    %9 = vector.load %arg12[%c0_9, %c0_10] : memref<128x128xf32, #tpu.memory_space<vmem>>, vector<128x128xf32>
    %c0_11 = arith.constant 0 : index
    %c0_12 = arith.constant 0 : index
    %10 = vector.load %arg13[%c0_11, %c0_12] : memref<1x128xf32, #tpu.memory_space<vmem>>, vector<1x128xf32>
    %c0_13 = arith.constant 0 : index
    %c0_14 = arith.constant 0 : index
    %11 = vector.load %arg2[%c0_13, %c0_14] : memref<128x384xf32, #tpu.memory_space<vmem>>, vector<128x384xf32>
    %cst_15 = arith.constant dense<0.000000e+00> : vector<16x384xf32>
    %12 = tpu.matmul %1, %11, %cst_15 {dimension_numbers = #tpu.dot_dimension_numbers<[1], [0], [0], [1], [0, 0, 1, 1], [], []>} : vector<16x128xf32>, vector<128x384xf32>, vector<16x384xf32> -> vector<16x384xf32>
    %13 = vector.shape_cast %12 : vector<16x384xf32> to vector<2x8x384xf32>
    %c0_16 = arith.constant 0 : index
    %c8 = arith.constant 8 : index
    %c0_17 = arith.constant 0 : index
    %14 = vector.load %arg15[%c0_16, %c8, %c0_17] : memref<2x16x384xf32, #tpu.memory_space<vmem>>, vector<2x8x384xf32>
    tpu.vector_store %arg15[%c0_16, %c8, %c0_17], %13 {strides = array<i32>} : memref<2x16x384xf32, #tpu.memory_space<vmem>>, vector<2x8x384xf32>,
    %c0_18 = arith.constant 0 : index
    %c6 = arith.constant 6 : index
    %c0_19 = arith.constant 0 : index
    %15 = vector.load %arg15[%c0_18, %c6, %c0_19] : memref<2x16x384xf32, #tpu.memory_space<vmem>>, vector<2x8x128xf32>
    %c0_20 = arith.constant 0 : index
    %c7 = arith.constant 7 : index
    %c128 = arith.constant 128 : index
    %16 = vector.load %arg15[%c0_20, %c7, %c128] : memref<2x16x384xf32, #tpu.memory_space<vmem>>, vector<2x8x128xf32>
    %17 = arith.addf %15, %16 : vector<2x8x128xf32>
    %c0_21 = arith.constant 0 : index
    %c8_22 = arith.constant 8 : index
    %c256 = arith.constant 256 : index
    %18 = vector.load %arg15[%c0_21, %c8_22, %c256] : memref<2x16x384xf32, #tpu.memory_space<vmem>>, vector<2x8x128xf32>
    %19 = arith.addf %17, %18 : vector<2x8x128xf32>
    %20 = vector.shape_cast %19 : vector<2x8x128xf32> to vector<16x128xf32>
    %c0_23 = arith.constant 0 : index
    %c0_24 = arith.constant 0 : index
    %21 = vector.load %arg3[%c0_23, %c0_24] : memref<1x128xf32, #tpu.memory_space<vmem>>, vector<1x128xf32>
    %22 = vector.broadcast %21 : vector<1x128xf32> to vector<16x128xf32>
    %23 = arith.addf %20, %22 : vector<16x128xf32>
    %cst_25 = arith.constant dense<0.000000e+00> : vector<16x128xf32>
    %24 = tpu.matmul %1, %7, %cst_25 {dimension_numbers = #tpu.dot_dimension_numbers<[1], [0], [0], [1], [0, 0, 1, 1], [], []>} : vector<16x128xf32>, vector<128x128xf32>, vector<16x128xf32> -> vector<16x128xf32>
    %25 = vector.broadcast %8 : vector<1x128xf32> to vector<16x128xf32>
    %26 = arith.addf %24, %25 : vector<16x128xf32>
    %cst_26 = arith.constant 0.000000e+00 : f32
    %27 = vector.broadcast %cst_26 : f32 to vector<16x128xf32>
    %28 = arith.cmpf ogt, %26, %27 : vector<16x128xf32>
    %cst_27 = arith.constant 0.00999999977 : f32
    %29 = vector.broadcast %cst_27 : f32 to vector<16x128xf32>
    %30 = arith.mulf %29, %26 : vector<16x128xf32>
    %31 = arith.select %28, %26, %30 : vector<16x128xi1>, vector<16x128xf32>
    %cst_28 = arith.constant dense<0.000000e+00> : vector<16x128xf32>
    %32 = tpu.matmul %31, %9, %cst_28 {dimension_numbers = #tpu.dot_dimension_numbers<[1], [0], [0], [1], [0, 0, 1, 1], [], []>} : vector<16x128xf32>, vector<128x128xf32>, vector<16x128xf32> -> vector<16x128xf32>
    %33 = vector.broadcast %10 : vector<1x128xf32> to vector<16x128xf32>
    %34 = arith.addf %32, %33 : vector<16x128xf32>
    %35 = arith.addf %23, %34 : vector<16x128xf32>
    %c0_29 = arith.constant 0 : index
    %c0_30 = arith.constant 0 : index
    %36 = vector.load %arg4[%c0_29, %c0_30] : memref<1x128xf32, #tpu.memory_space<vmem>>, vector<1x128xf32>
    %c0_31 = arith.constant 0 : index
    %c0_32 = arith.constant 0 : index
    %37 = vector.load %arg5[%c0_31, %c0_32] : memref<1x128xf32, #tpu.memory_space<vmem>>, vector<1x128xf32>
    %cst_33 = arith.constant dense<0.000000e+00> : vector<16xf32>
    %38 = vector.multi_reduction <add>, %35, %cst_33 [1] : vector<16x128xf32> to vector<16xf32>
    %39 = vector.shape_cast %38 : vector<16xf32> to vector<16x1xf32>
    %cst_34 = arith.constant 3.125000e-02 : f32
    %40 = vector.broadcast %cst_34 : f32 to vector<16x1xf32>
    %41 = arith.mulf %39, %40 : vector<16x1xf32>
    %42 = vector.broadcast %41 : vector<16x1xf32> to vector<16x128xf32>
    %43 = arith.subf %35, %42 : vector<16x128xf32>
    %cst_35 = arith.constant 0.000000e+00 : f32
    %44 = vector.broadcast %cst_35 : f32 to vector<16x128xf32>
    %45 = arith.select %4, %43, %44 : vector<16x128xi1>, vector<16x128xf32>
    %46 = arith.mulf %45, %45 : vector<16x128xf32>
    %cst_36 = arith.constant dense<0.000000e+00> : vector<16xf32>
    %47 = vector.multi_reduction <add>, %46, %cst_36 [1] : vector<16x128xf32> to vector<16xf32>
    %48 = vector.shape_cast %47 : vector<16xf32> to vector<16x1xf32>
    %cst_37 = arith.constant 3.125000e-02 : f32
    %49 = vector.broadcast %cst_37 : f32 to vector<16x1xf32>
    %50 = arith.mulf %48, %49 : vector<16x1xf32>
    %cst_38 = arith.constant 9.99999993E-9 : f32
    %51 = vector.broadcast %cst_38 : f32 to vector<16x1xf32>
    %52 = arith.addf %50, %51 : vector<16x1xf32>
    %53 = math.rsqrt %52 : vector<16x1xf32>
    %54 = vector.broadcast %53 : vector<16x1xf32> to vector<16x128xf32>
    %55 = arith.mulf %45, %54 : vector<16x128xf32>
    %56 = vector.broadcast %36 : vector<1x128xf32> to vector<16x128xf32>
    %57 = arith.mulf %55, %56 : vector<16x128xf32>
    %58 = vector.broadcast %37 : vector<1x128xf32> to vector<16x128xf32>
    %59 = arith.addf %57, %58 : vector<16x128xf32>
    %cst_39 = arith.constant 0.000000e+00 : f32
    %60 = vector.broadcast %cst_39 : f32 to vector<16x128xf32>
    %61 = arith.maximumf %59, %60 : vector<16x128xf32>
    %c0_40 = arith.constant 0 : index
    %c0_41 = arith.constant 0 : index
    %62 = vector.load %arg6[%c0_40, %c0_41] : memref<128x384xf32, #tpu.memory_space<vmem>>, vector<128x384xf32>
    %cst_42 = arith.constant dense<0.000000e+00> : vector<16x384xf32>
    %63 = tpu.matmul %61, %62, %cst_42 {dimension_numbers = #tpu.dot_dimension_numbers<[1], [0], [0], [1], [0, 0, 1, 1], [], []>} : vector<16x128xf32>, vector<128x384xf32>, vector<16x384xf32> -> vector<16x384xf32>
    %64 = vector.shape_cast %63 : vector<16x384xf32> to vector<2x8x384xf32>
    %c0_43 = arith.constant 0 : index
    %c8_44 = arith.constant 8 : index
    %c0_45 = arith.constant 0 : index
    %65 = vector.load %arg15[%c0_43, %c8_44, %c0_45] : memref<2x16x384xf32, #tpu.memory_space<vmem>>, vector<2x8x384xf32>
    tpu.vector_store %arg15[%c0_43, %c8_44, %c0_45], %64 {strides = array<i32>} : memref<2x16x384xf32, #tpu.memory_space<vmem>>, vector<2x8x384xf32>,
    %c0_46 = arith.constant 0 : index
    %c4 = arith.constant 4 : index
    %c0_47 = arith.constant 0 : index
    %66 = vector.load %arg15[%c0_46, %c4, %c0_47] : memref<2x16x384xf32, #tpu.memory_space<vmem>>, vector<2x8x128xf32>
    %c0_48 = arith.constant 0 : index
    %c6_49 = arith.constant 6 : index
    %c128_50 = arith.constant 128 : index
    %67 = vector.load %arg15[%c0_48, %c6_49, %c128_50] : memref<2x16x384xf32, #tpu.memory_space<vmem>>, vector<2x8x128xf32>
    %68 = arith.addf %66, %67 : vector<2x8x128xf32>
    %c0_51 = arith.constant 0 : index
    %c8_52 = arith.constant 8 : index
    %c256_53 = arith.constant 256 : index
    %69 = vector.load %arg15[%c0_51, %c8_52, %c256_53] : memref<2x16x384xf32, #tpu.memory_space<vmem>>, vector<2x8x128xf32>
    %70 = arith.addf %68, %69 : vector<2x8x128xf32>
    %71 = vector.shape_cast %70 : vector<2x8x128xf32> to vector<16x128xf32>
    %c0_54 = arith.constant 0 : index
    %c0_55 = arith.constant 0 : index
    %72 = vector.load %arg7[%c0_54, %c0_55] : memref<1x128xf32, #tpu.memory_space<vmem>>, vector<1x128xf32>
    %73 = vector.broadcast %72 : vector<1x128xf32> to vector<16x128xf32>
    %74 = arith.addf %71, %73 : vector<16x128xf32>
    %cst_56 = arith.constant dense<0.000000e+00> : vector<16x128xf32>
    %75 = tpu.matmul %61, %7, %cst_56 {dimension_numbers = #tpu.dot_dimension_numbers<[1], [0], [0], [1], [0, 0, 1, 1], [], []>} : vector<16x128xf32>, vector<128x128xf32>, vector<16x128xf32> -> vector<16x128xf32>
    %76 = vector.broadcast %8 : vector<1x128xf32> to vector<16x128xf32>
    %77 = arith.addf %75, %76 : vector<16x128xf32>
    %cst_57 = arith.constant 0.000000e+00 : f32
    %78 = vector.broadcast %cst_57 : f32 to vector<16x128xf32>
    %79 = arith.cmpf ogt, %77, %78 : vector<16x128xf32>
    %cst_58 = arith.constant 0.00999999977 : f32
    %80 = vector.broadcast %cst_58 : f32 to vector<16x128xf32>
    %81 = arith.mulf %80, %77 : vector<16x128xf32>
    %82 = arith.select %79, %77, %81 : vector<16x128xi1>, vector<16x128xf32>
    %cst_59 = arith.constant dense<0.000000e+00> : vector<16x128xf32>
    %83 = tpu.matmul %82, %9, %cst_59 {dimension_numbers = #tpu.dot_dimension_numbers<[1], [0], [0], [1], [0, 0, 1, 1], [], []>} : vector<16x128xf32>, vector<128x128xf32>, vector<16x128xf32> -> vector<16x128xf32>
    %84 = vector.broadcast %10 : vector<1x128xf32> to vector<16x128xf32>
    %85 = arith.addf %83, %84 : vector<16x128xf32>
    %86 = arith.addf %74, %85 : vector<16x128xf32>
    %c0_60 = arith.constant 0 : index
    %c0_61 = arith.constant 0 : index
    %87 = vector.load %arg8[%c0_60, %c0_61] : memref<1x128xf32, #tpu.memory_space<vmem>>, vector<1x128xf32>
    %c0_62 = arith.constant 0 : index
    %c0_63 = arith.constant 0 : index
    %88 = vector.load %arg9[%c0_62, %c0_63] : memref<1x128xf32, #tpu.memory_space<vmem>>, vector<1x128xf32>
    %cst_64 = arith.constant dense<0.000000e+00> : vector<16xf32>
    %89 = vector.multi_reduction <add>, %86, %cst_64 [1] : vector<16x128xf32> to vector<16xf32>
    %90 = vector.shape_cast %89 : vector<16xf32> to vector<16x1xf32>
    %cst_65 = arith.constant 3.125000e-02 : f32
    %91 = vector.broadcast %cst_65 : f32 to vector<16x1xf32>
    %92 = arith.mulf %90, %91 : vector<16x1xf32>
    %93 = vector.broadcast %92 : vector<16x1xf32> to vector<16x128xf32>
    %94 = arith.subf %86, %93 : vector<16x128xf32>
    %cst_66 = arith.constant 0.000000e+00 : f32
    %95 = vector.broadcast %cst_66 : f32 to vector<16x128xf32>
    %96 = arith.select %4, %94, %95 : vector<16x128xi1>, vector<16x128xf32>
    %97 = arith.mulf %96, %96 : vector<16x128xf32>
    %cst_67 = arith.constant dense<0.000000e+00> : vector<16xf32>
    %98 = vector.multi_reduction <add>, %97, %cst_67 [1] : vector<16x128xf32> to vector<16xf32>
    %99 = vector.shape_cast %98 : vector<16xf32> to vector<16x1xf32>
    %cst_68 = arith.constant 3.125000e-02 : f32
    %100 = vector.broadcast %cst_68 : f32 to vector<16x1xf32>
    %101 = arith.mulf %99, %100 : vector<16x1xf32>
    %cst_69 = arith.constant 9.99999993E-9 : f32
    %102 = vector.broadcast %cst_69 : f32 to vector<16x1xf32>
    %103 = arith.addf %101, %102 : vector<16x1xf32>
    %104 = math.rsqrt %103 : vector<16x1xf32>
    %105 = vector.broadcast %104 : vector<16x1xf32> to vector<16x128xf32>
    %106 = arith.mulf %96, %105 : vector<16x128xf32>
    %107 = vector.broadcast %87 : vector<1x128xf32> to vector<16x128xf32>
    %108 = arith.mulf %106, %107 : vector<16x128xf32>
    %109 = vector.broadcast %88 : vector<1x128xf32> to vector<16x128xf32>
    %110 = arith.addf %108, %109 : vector<16x128xf32>
    %cst_70 = arith.constant 0.000000e+00 : f32
    %111 = vector.broadcast %cst_70 : f32 to vector<16x128xf32>
    %112 = arith.maximumf %110, %111 : vector<16x128xf32>
    %113 = arith.addf %112, %1 : vector<16x128xf32>
    %114 = vector.shape_cast %113 : vector<16x128xf32> to vector<2x8x128xf32>
    %c0_71 = arith.constant 0 : index
    %c0_72 = arith.constant 0 : index
    %c0_73 = arith.constant 0 : index
    %115 = vector.load %arg14[%c0_71, %c0_72, %c0_73] : memref<2x8x128xf32, #tpu.memory_space<vmem>>, vector<2x8x128xf32>
    tpu.vector_store %arg14[%c0_71, %c0_72, %c0_73], %114 {strides = array<i32>} : memref<2x8x128xf32, #tpu.memory_space<vmem>>, vector<2x8x128xf32>,
    return
  }
  func.func @transform_0(%arg0: i32) -> (i32, i32, i32) {
    %c0_i32 = arith.constant 0 : i32
    %c0_i32_0 = arith.constant 0 : i32
    %c0_i32_1 = arith.constant 0 : i32
    return %arg0, %c0_i32, %c0_i32_0 : i32, i32, i32
  }
  func.func @transform_1(%arg0: i32) -> (i32, i32) {
    %c0_i32 = arith.constant 0 : i32
    %c0_i32_0 = arith.constant 0 : i32
    %c0_i32_1 = arith.constant 0 : i32
    return %c0_i32, %c0_i32_0 : i32, i32
  }
  func.func @transform_2(%arg0: i32) -> (i32, i32) {
    %c0_i32 = arith.constant 0 : i32
    %c0_i32_0 = arith.constant 0 : i32
    %c0_i32_1 = arith.constant 0 : i32
    return %c0_i32, %c0_i32_0 : i32, i32
  }
  func.func @transform_3(%arg0: i32) -> (i32, i32) {
    %c0_i32 = arith.constant 0 : i32
    %c0_i32_0 = arith.constant 0 : i32
    %c0_i32_1 = arith.constant 0 : i32
    return %c0_i32, %c0_i32_0 : i32, i32
  }
  func.func @transform_4(%arg0: i32) -> (i32, i32) {
    %c0_i32 = arith.constant 0 : i32
    %c0_i32_0 = arith.constant 0 : i32
    %c0_i32_1 = arith.constant 0 : i32
    return %c0_i32, %c0_i32_0 : i32, i32
  }
  func.func @transform_5(%arg0: i32) -> (i32, i32) {
    %c0_i32 = arith.constant 0 : i32
    %c0_i32_0 = arith.constant 0 : i32
    %c0_i32_1 = arith.constant 0 : i32
    return %c0_i32, %c0_i32_0 : i32, i32
  }
  func.func @transform_6(%arg0: i32) -> (i32, i32) {
    %c0_i32 = arith.constant 0 : i32
    %c0_i32_0 = arith.constant 0 : i32
    %c0_i32_1 = arith.constant 0 : i32
    return %c0_i32, %c0_i32_0 : i32, i32
  }
  func.func @transform_7(%arg0: i32) -> (i32, i32) {
    %c0_i32 = arith.constant 0 : i32
    %c0_i32_0 = arith.constant 0 : i32
    %c0_i32_1 = arith.constant 0 : i32
    return %c0_i32, %c0_i32_0 : i32, i32
  }
  func.func @transform_8(%arg0: i32) -> (i32, i32) {
    %c0_i32 = arith.constant 0 : i32
    %c0_i32_0 = arith.constant 0 : i32
    %c0_i32_1 = arith.constant 0 : i32
    return %c0_i32, %c0_i32_0 : i32, i32
  }
  func.func @transform_9(%arg0: i32) -> (i32, i32) {
    %c0_i32 = arith.constant 0 : i32
    %c0_i32_0 = arith.constant 0 : i32
    %c0_i32_1 = arith.constant 0 : i32
    return %c0_i32, %c0_i32_0 : i32, i32
  }
  func.func @transform_10(%arg0: i32) -> (i32, i32) {
    %c0_i32 = arith.constant 0 : i32
    %c0_i32_0 = arith.constant 0 : i32
    %c0_i32_1 = arith.constant 0 : i32
    return %c0_i32, %c0_i32_0 : i32, i32
  }
  func.func @transform_11(%arg0: i32) -> (i32, i32) {
    %c0_i32 = arith.constant 0 : i32
    %c0_i32_0 = arith.constant 0 : i32
    %c0_i32_1 = arith.constant 0 : i32
    return %c0_i32, %c0_i32_0 : i32, i32
  }
  func.func @transform_12(%arg0: i32) -> (i32, i32) {
    %c0_i32 = arith.constant 0 : i32
    %c0_i32_0 = arith.constant 0 : i32
    %c0_i32_1 = arith.constant 0 : i32
    return %c0_i32, %c0_i32_0 : i32, i32
  }
  func.func @transform_13(%arg0: i32) -> (i32, i32, i32) {
    %c0_i32 = arith.constant 0 : i32
    %c0_i32_0 = arith.constant 0 : i32
    %c0_i32_1 = arith.constant 0 : i32
    return %arg0, %c0_i32, %c0_i32_0 : i32, i32, i32
  }
}

</mosaic_0001>

<bundles_post_ra>
// kernel: tpu_custom_call.1
= control target key start
LH: loop header
LB: loop body
LE: loop exit
PB: predicated region body
PF: predicated region fallthrough
CT: control target
= control target key end

     0   :  { %18 = vsyncpa [#allocation4], 0  ;;  %s1990_s0 = inlined_call_operand.hbm [shape: f32[2,8,128], index: 0, kind: input, shape index: {}]   ;;  %s1991_s1 = inlined_call_operand.hbm [shape: f32[128,384], index: 1, kind: input, shape index: {}]   ;;  %s1992_s2 = inlined_call_operand.vmem [shape: f32[1,128], index: 2, kind: input, shape index: {}]   ;;  %s1993_s3 = inlined_call_operand.vmem [shape: f32[1,128], index: 3, kind: input, shape index: {}]   ;;  %s1994_s4 = inlined_call_operand.vmem [shape: f32[1,128], index: 4, kind: input, shape index: {}]   ;;  %s1995_s5 = inlined_call_operand.hbm [shape: f32[128,384], index: 5, kind: input, shape index: {}]   ;;  %s1996_s6 = inlined_call_operand.vmem [shape: f32[1,128], index: 6, kind: input, shape index: {}]   ;;  %s1997_s7 = inlined_call_operand.vmem [shape: f32[1,128], index: 7, kind: input, shape index: {}]   ;;  %s1998_s8 = inlined_call_operand.vmem [shape: f32[1,128], index: 8, kind: input, shape index: {}]   ;;  %s1999_s9 = inlined_call_operand.hbm [shape: f32[128,128], index: 9, kind: input, shape index: {}]   ;;  %s2000_s10 = inlined_call_operand.vmem [shape: f32[1,128], index: 10, kind: input, shape index: {}]   ;;  %s2001_s11 = inlined_call_operand.hbm [shape: f32[128,128], index: 11, kind: input, shape index: {}]   ;;  %s2002_s12 = inlined_call_operand.vmem [shape: f32[1,128], index: 12, kind: input, shape index: {}]   ;;  %s2003_s13 = inlined_call_operand.hbm [shape: f32[2,8,128], index: 13, kind: output, shape index: {}]  }
   0x1   :  { %19 = vsyncpa [#allocation7], 0 }
   0x2   :  { %20 = vsyncpa [#allocation10], 0 }
   0x3   :  { %21 = vsyncpa [#allocation5], 0  ;;  %s1604_s25 = smov [#allocation6]  }
   0x4   :  { %s39_s26 = sshll.u32 %s1604_s25, 4  ;;  %s40_s26 = int_to_ptr.vmem [resolvable:$true] %s39_s26 }
   0x5   :  { %s1484_s27 = scalar_lea.vmem %s40_s26, 6144  ;;  %p1489_p1 = scmp.lt.s32.totalorder %s40_s26, %s40_s26 }
   0x6   :  { %p1485_p0 = scmp.ne.s32.totalorder %s40_s26, %s1484_s27  ;;  %p1490_p2 = scmp.lt.s32.totalorder %s1484_s27, %s1484_s27 }
   0x8   :  { %p1491_p3 = por %p1490_p2, %p1489_p1 }
   0xa   :  { %p1492_p4 = pnand %p1491_p3, %p1485_p0 }
   0xc   :  { %1495 = shalt.err (!%p1492_p4)
}
   0xd   :  { %s1605_s28 = smov 384   ;;  %s1606_s29 = smov 24  }
   0xe   :  { %45 = dma.hbm_to_vmem [thread:$0]  %s1991_s1, 6144, %s40_s26, [#allocation7], %s1605_s28, %s1605_s28, %s1606_s29  }
   0xf   :  { %s1607_s15 = smov [#allocation9]   ;;  %s1608_s17 = smov [#allocation3]  }
  0x10   :  { %s75_s16 = sshll.u32 %s1607_s15, 4  ;;  %s27_s18 = sshll.u32 %s1608_s17, 4  ;;  %s76_s16 = int_to_ptr.vmem [resolvable:$true] %s75_s16  ;;  %s28_s18 = int_to_ptr.vmem [resolvable:$true] %s27_s18 }
  0x11   :  { %s1504_s19 = scalar_lea.vmem %s76_s16, 2048  ;;  %p1509_p6 = scmp.lt.s32.totalorder %s76_s16, %s76_s16 }
  0x12   :  { %p1505_p5 = scmp.ne.s32.totalorder %s76_s16, %s1504_s19  ;;  %p1510_p7 = scmp.lt.s32.totalorder %s1504_s19, %s1504_s19 }
  0x14   :  { %p1511_p8 = por %p1510_p7, %p1509_p6 }
  0x16   :  { %p1512_p9 = pnand %p1511_p8, %p1505_p5 }
  0x18   :  { %1515 = shalt.err (!%p1512_p9)
}
  0x19   :  { %s1609_s20 = smov 128   ;;  %s1610_s21 = smov 8  }
  0x1a   :  { %81 = dma.hbm_to_vmem [thread:$0]  %s1999_s9, 2048, %s76_s16, [#allocation10], %s1609_s20, %s1609_s20, %s1610_s21  }
  0x1b   :  { %s1524_s1 = scalar_lea.vmem %s28_s18, 256  ;;  %p1529_p11 = scmp.lt.s32.totalorder %s28_s18, %s28_s18 }
  0x1c   :  { %p1525_p10 = scmp.ne.s32.totalorder %s28_s18, %s1524_s1  ;;  %p1530_p12 = scmp.lt.s32.totalorder %s1524_s1, %s1524_s1 }
  0x1e   :  { %p1531_p13 = por %p1530_p12, %p1529_p11 }
  0x20   :  { %p1532_p0 = pnand %p1531_p13, %p1525_p10 }
  0x22   :  { %1535 = shalt.err (!%p1532_p0)
}
  0x23   :  { %33 = dma.hbm_to_vmem [thread:$0]  %s1990_s0, 256, %s28_s18, [#allocation4], %s1609_s20, %s1609_s20, %s1610_s21  }
  0x24   :  { %s1611_s26 = smov [#allocation8]   ;;  %s1612_s30 = smov [#allocation11]  }
  0x25   :  { %s57_s27 = sshll.u32 %s1611_s26, 4  ;;  %s89_s9 = sshll.u32 %s1612_s30, 4  ;;  %s58_s27 = int_to_ptr.vmem [resolvable:$true] %s57_s27  ;;  %s90_s9 = int_to_ptr.vmem [resolvable:$true] %s89_s9 }
  0x26   :  { %s1544_s14 = scalar_lea.vmem %s58_s27, 6144  ;;  %p1549_p2 = scmp.lt.s32.totalorder %s58_s27, %s58_s27 }
  0x27   :  { %p1545_p1 = scmp.ne.s32.totalorder %s58_s27, %s1544_s14  ;;  %p1550_p3 = scmp.lt.s32.totalorder %s1544_s14, %s1544_s14 }
  0x29   :  { %p1551_p4 = por %p1550_p3, %p1549_p2 }
  0x2b   :  { %p1552_p5 = pnand %p1551_p4, %p1545_p1 }
  0x2d   :  { %1555 = shalt.err (!%p1552_p5)
}
  0x2e   :  { %63 = dma.hbm_to_vmem [thread:$0]  %s1995_s5, 6144, %s58_s27, [#allocation7], %s1605_s28, %s1605_s28, %s1606_s29  }
  0x2f   :  { %s1564_s0 = scalar_lea.vmem %s90_s9, 2048  ;;  %p1569_p7 = scmp.lt.s32.totalorder %s90_s9, %s90_s9 }
  0x30   :  { %p1565_p6 = scmp.ne.s32.totalorder %s90_s9, %s1564_s0  ;;  %p1570_p8 = scmp.lt.s32.totalorder %s1564_s0, %s1564_s0 }
  0x32   :  { %p1571_p9 = por %p1570_p8, %p1569_p7 }
  0x34   :  { %p1572_p10 = pnand %p1571_p9, %p1565_p6 }
  0x36   :  { %1575 = shalt.err (!%p1572_p10)
}
  0x37   :  { %95 = dma.hbm_to_vmem [thread:$0]  %s2001_s11, 2048, %s90_s9, [#allocation10], %s1609_s20, %s1609_s20, %s1610_s21  }
  0x38   :  { %1596 = dma.done.wait [#allocation4], 256  }
  0x39   :  { %1597 = vsyncadd [#allocation4], 4294967040 }
  0x3a   :  { %1598 = dma.done.wait [#allocation7], 12288  }
  0x3b   :  { %1599 = vsyncadd [#allocation7], 4294955008 }
  0x3c   :  { %1600 = dma.done.wait [#allocation10], 4096  }
  0x3d   :  { %1601 = vsyncadd [#allocation10], 4294963200  ;;  %v1613_v0 = vmov 0.0   ;;  %v204_v1 = vld [vmem:[#allocation6 + $0x170] sm:$0xff]  ;;  %v203_v2 = vld [vmem:[#allocation6 + $0x168] sm:$0xff]  ;;  %vm376_vm2 = vcmask 1046528  }
  0x3e   :  { %270 = vmatprep.mubr.f32.mxu0 %v1613_v0  ;;  %118 = vst [vmem:[#allocation2 + $0x18] sm:$0xff] %v1613_v0  ;;  %119 = vst [vmem:[#allocation2] sm:$0xff] %v1613_v0  ;;  %v201_v3 = vld [vmem:[#allocation6 + $0x158] sm:$0xff]  ;;  %206 = vmatprep.subr.mxu0 %v204_v1  ;;  %v200_v5 = vld [vmem:[#allocation6 + $0x150] sm:$0xff]  ;;  %vm407_vm3 = vcmask 1041408   ;;  %vm857_vm7 = vcmask 1045504  }
  0x3f   :  { %121 = vst [vmem:[#allocation2 + $0x30] sm:$0xff] %v1613_v0  ;;  %122 = vst [vmem:[#allocation2 + $0x50] sm:$0xff] %v1613_v0  ;;  %v205_v4 = vld [vmem:[#allocation6 + $0x178] sm:$0xff]  ;;  %207 = vmatpush1.msra.mxu0 %v203_v2  ;;  %v198_v6 = vld [vmem:[#allocation6 + $0x140] sm:$0xff]  ;;  %vm888_vm8 = vcmask 1043456   ;;  %s1614_s26 = smov [#allocation12]  }
  0x40   :  { %1247 = vmatprep.subr.mxu1 %v205_v4  ;;  %v202_v7 = vld [vmem:[#allocation6 + $0x160] sm:$0xff]  ;;  %208 = vmatprep.subr.mxu0 %v201_v3  ;;  %v197_v8 = vld [vmem:[#allocation6 + $0x138] sm:$0xff]  ;;  %v199_v9 = vld [vmem:[#allocation6 + $0x148] sm:$0xff]  ;;  %s1117_s27 = sshll.u32 %s1614_s26, 4  ;;  %s1118_s27 = int_to_ptr.vmem [resolvable:$true] %s1117_s27 }
  0x41   :  { %1248 = vmatpush3.msra.mxu1 %v205_v4  ;;  %209 = vmatpush1.msra.mxu0 %v200_v5  ;;  %v195_v10 = vld [vmem:[#allocation6 + $0x128] sm:$0xff]  ;;  %v194_v11 = vld [vmem:[#allocation6 + $0x120] sm:$0xff]  ;;  %v196_v12 = vld [vmem:[#allocation6 + $0x130] sm:$0xff]  ;;  %p1581_p12 = scmp.lt.s32.totalorder %s1118_s27, %s1118_s27 }
  0x42   :  { %1249 = vmatprep.subr.mxu1 %v202_v7  ;;  %210 = vmatprep.subr.mxu0 %v198_v6  ;;  %v192_v13 = vld [vmem:[#allocation6 + $0x110] sm:$0xff]  ;;  %v191_v14 = vld [vmem:[#allocation6 + $0x108] sm:$0xff]  ;;  %v193_v15 = vld [vmem:[#allocation6 + $0x118] sm:$0xff] }
  0x43   :  { %1250 = vmatpush3.msra.mxu1 %v202_v7  ;;  %211 = vmatpush1.msra.mxu0 %v197_v8  ;;  %v189_v16 = vld [vmem:[#allocation6 + $0xf8] sm:$0xff]  ;;  %v188_v17 = vld [vmem:[#allocation6 + $0xf0] sm:$0xff]  ;;  %v190_v18 = vld [vmem:[#allocation6 + $0x100] sm:$0xff] }
  0x44   :  { %1251 = vmatprep.subr.mxu1 %v199_v9  ;;  %212 = vmatprep.subr.mxu0 %v195_v10  ;;  %v186_v19 = vld [vmem:[#allocation6 + $0xe0] sm:$0xff]  ;;  %v185_v20 = vld [vmem:[#allocation6 + $0xd8] sm:$0xff]  ;;  %v187_v21 = vld [vmem:[#allocation6 + $0xe8] sm:$0xff] }
  0x45   :  { %1252 = vmatpush3.msra.mxu1 %v199_v9  ;;  %213 = vmatpush1.msra.mxu0 %v194_v11  ;;  %v183_v22 = vld [vmem:[#allocation6 + $0xc8] sm:$0xff]  ;;  %v182_v23 = vld [vmem:[#allocation6 + $0xc0] sm:$0xff]  ;;  %v184_v24 = vld [vmem:[#allocation6 + $0xd0] sm:$0xff] }
  0x46   :  { %1253 = vmatprep.subr.mxu1 %v196_v12  ;;  %214 = vmatprep.subr.mxu0 %v192_v13  ;;  %v180_v25 = vld [vmem:[#allocation6 + $0xb0] sm:$0xff]  ;;  %v179_v26 = vld [vmem:[#allocation6 + $0xa8] sm:$0xff]  ;;  %v181_v27 = vld [vmem:[#allocation6 + $0xb8] sm:$0xff] }
  0x47   :  { %1254 = vmatpush3.msra.mxu1 %v196_v12  ;;  %215 = vmatpush1.msra.mxu0 %v191_v14  ;;  %v177_v28 = vld [vmem:[#allocation6 + $0x98] sm:$0xff]  ;;  %v176_v29 = vld [vmem:[#allocation6 + $0x90] sm:$0xff]  ;;  %v178_v30 = vld [vmem:[#allocation6 + $0xa0] sm:$0xff] }
  0x48   :  { %1255 = vmatprep.subr.mxu1 %v193_v15  ;;  %216 = vmatprep.subr.mxu0 %v189_v16  ;;  %v174_v31 = vld [vmem:[#allocation6 + $0x80] sm:$0xff]  ;;  %v173_v32 = vld [vmem:[#allocation6 + $0x78] sm:$0xff]  ;;  %v175_v33 = vld [vmem:[#allocation6 + $0x88] sm:$0xff] }
  0x49   :  { %1256 = vmatpush3.msra.mxu1 %v193_v15  ;;  %217 = vmatpush1.msra.mxu0 %v188_v17  ;;  %v171_v34 = vld [vmem:[#allocation6 + $0x68] sm:$0xff]  ;;  %v170_v35 = vld [vmem:[#allocation6 + $0x60] sm:$0xff]  ;;  %v172_v36 = vld [vmem:[#allocation6 + $0x70] sm:$0xff] }
  0x4a   :  { %1257 = vmatprep.subr.mxu1 %v190_v18  ;;  %218 = vmatprep.subr.mxu0 %v186_v19  ;;  %v168_v37 = vld [vmem:[#allocation6 + $0x50] sm:$0xff]  ;;  %v167_v38 = vld [vmem:[#allocation6 + $0x48] sm:$0xff]  ;;  %v169_v39 = vld [vmem:[#allocation6 + $0x58] sm:$0xff] }
  0x4b   :  { %1258 = vmatpush3.msra.mxu1 %v190_v18  ;;  %219 = vmatpush1.msra.mxu0 %v185_v20  ;;  %v165_v40 = vld [vmem:[#allocation6 + $0x38] sm:$0xff]  ;;  %v164_v41 = vld [vmem:[#allocation6 + $0x30] sm:$0xff]  ;;  %v166_v42 = vld [vmem:[#allocation6 + $0x40] sm:$0xff] }
  0x4c   :  { %1259 = vmatprep.subr.mxu1 %v187_v21  ;;  %220 = vmatprep.subr.mxu0 %v183_v22  ;;  %v162_v43 = vld [vmem:[#allocation6 + $0x20] sm:$0xff]  ;;  %v161_v44 = vld [vmem:[#allocation6 + $0x18] sm:$0xff]  ;;  %v163_v45 = vld [vmem:[#allocation6 + $0x28] sm:$0xff] }
  0x4d   :  { %1260 = vmatpush3.msra.mxu1 %v187_v21  ;;  %221 = vmatpush1.msra.mxu0 %v182_v23  ;;  %v159_v46 = vld [vmem:[#allocation6 + $0x8] sm:$0xff]  ;;  %v158_v47 = vld [vmem:[#allocation6] sm:$0xff]  ;;  %v160_v48 = vld [vmem:[#allocation6 + $0x10] sm:$0xff] }
  0x4e   :  { %1261 = vmatprep.subr.mxu1 %v184_v24  ;;  %222 = vmatprep.subr.mxu0 %v180_v25  ;;  %v1720_v49 = vld [vmem:[#allocation3] sm:$0xff]  ;;  %v1722_v50 = vld [vmem:[#allocation9 + $0x78] sm:$0xff]  ;;  %v1733_v53 = vld [vmem:[#allocation9 + $0x68] sm:$0xff] }
  0x4f   :  { %1262 = vmatpush3.msra.mxu1 %v184_v24  ;;  %223 = vmatpush1.msra.mxu0 %v179_v26  ;;  %v1724_v51 = vld [vmem:[#allocation3 + $0x8] sm:$0xff]  ;;  %v1728_v52 = vld [vmem:[#allocation9 + $0x70] sm:$0xff]  ;;  %v1738_v54 = vld [vmem:[#allocation9 + $0x60] sm:$0xff] }
  0x50   :  { %1263 = vmatprep.subr.mxu1 %v181_v27  ;;  %224 = vmatprep.subr.mxu0 %v177_v28  ;;  %v1743_v55 = vld [vmem:[#allocation9 + $0x58] sm:$0xff]  ;;  %v1748_v56 = vld [vmem:[#allocation9 + $0x50] sm:$0xff]  ;;  %v1752_v57 = vld [vmem:[#allocation9 + $0x48] sm:$0xff] }
  0x51   :  { %1264 = vmatpush3.msra.mxu1 %v181_v27  ;;  %225 = vmatpush1.msra.mxu0 %v176_v29  ;;  %v1756_v58 = vld [vmem:[#allocation9 + $0x40] sm:$0xff]  ;;  %v1760_v59 = vld [vmem:[#allocation9 + $0x38] sm:$0xff]  ;;  %v1764_v60 = vld [vmem:[#allocation9 + $0x30] sm:$0xff] }
  0x52   :  { %1265 = vmatprep.subr.mxu1 %v178_v30  ;;  %226 = vmatprep.subr.mxu0 %v174_v31  ;;  %v1768_v61 = vld [vmem:[#allocation9 + $0x28] sm:$0xff]  ;;  %v1772_v62 = vld [vmem:[#allocation9 + $0x20] sm:$0xff]  ;;  %v1776_v63 = vld [vmem:[#allocation9 + $0x18] sm:$0xff] }
  0x53   :  { %1266 = vmatpush3.msra.mxu1 %v178_v30  ;;  %227 = vmatpush1.msra.mxu0 %v173_v32  ;;  %v1780_v1 = vld [vmem:[#allocation9 + $0x10] sm:$0xff]  ;;  %v1784_v2 = vld [vmem:[#allocation9 + $0x8] sm:$0xff]  ;;  %v1788_v3 = vld [vmem:[#allocation9] sm:$0xff] }
  0x54   :  { %1267 = vmatprep.subr.mxu1 %v175_v33  ;;  %228 = vmatprep.subr.mxu0 %v171_v34  ;;  %v1796_v4 = vld [vmem:[#allocation11 + $0x78] sm:$0xff]  ;;  %v1798_v5 = vld [vmem:[#allocation11 + $0x70] sm:$0xff]  ;;  %v1802_v6 = vld [vmem:[#allocation11 + $0x68] sm:$0xff] }
  0x55   :  { %1268 = vmatpush3.msra.mxu1 %v175_v33  ;;  %229 = vmatpush1.msra.mxu0 %v170_v35  ;;  %v1806_v7 = vld [vmem:[#allocation11 + $0x60] sm:$0xff]  ;;  %v1810_v8 = vld [vmem:[#allocation11 + $0x58] sm:$0xff]  ;;  %v1814_v9 = vld [vmem:[#allocation11 + $0x50] sm:$0xff] }
  0x56   :  { %1269 = vmatprep.subr.mxu1 %v172_v36  ;;  %230 = vmatprep.subr.mxu0 %v168_v37  ;;  %v1818_v10 = vld [vmem:[#allocation11 + $0x48] sm:$0xff]  ;;  %v1822_v11 = vld [vmem:[#allocation11 + $0x40] sm:$0xff]  ;;  %v1826_v12 = vld [vmem:[#allocation11 + $0x38] sm:$0xff] }
  0x57   :  { %1270 = vmatpush3.msra.mxu1 %v172_v36  ;;  %231 = vmatpush1.msra.mxu0 %v167_v38  ;;  %v1830_v13 = vld [vmem:[#allocation11 + $0x30] sm:$0xff]  ;;  %v1834_v14 = vld [vmem:[#allocation11 + $0x28] sm:$0xff]  ;;  %v1838_v15 = vld [vmem:[#allocation11 + $0x20] sm:$0xff] }
  0x58   :  { %1271 = vmatprep.subr.mxu1 %v169_v39  ;;  %232 = vmatprep.subr.mxu0 %v165_v40  ;;  %v1844_v16 = vld [vmem:[#allocation11 + $0x18] sm:$0xff]  ;;  %v1848_v17 = vld [vmem:[#allocation11 + $0x10] sm:$0xff]  ;;  %v1852_v18 = vld [vmem:[#allocation11 + $0x8] sm:$0xff] }
  0x59   :  { %1272 = vmatpush3.msra.mxu1 %v169_v39  ;;  %233 = vmatpush1.msra.mxu0 %v164_v41  ;;  %v1855_v19 = vld [vmem:[#allocation11] sm:$0xff]  ;;  %v1863_v24 = vld [vmem:[%s2000_s10] ss:$0 sm:$0xff]  ;;  %v368_v33 = vld [vmem:[#allocation2] sm:$0x80] }
  0x5a   :  { %1273 = vmatprep.subr.mxu1 %v166_v42  ;;  %234 = vmatprep.subr.mxu0 %v162_v43  ;;  %v377_v36 = vrot.slane %v368_v33, 1  ;;  %v370_v38 = vld [vmem:[#allocation2 + $0x50] sm:$0x80]  ;;  %v364_v41 = vld [vmem:[#allocation2 + $0x18] sm:$0xc0] }
  0x5b   :  { %1274 = vmatpush3.msra.mxu1 %v166_v42  ;;  %235 = vmatpush1.msra.mxu0 %v161_v44  ;;  %v380_v43 = vrot.slane %v370_v38, 1 }
  0x5c   :  { %1275 = vmatprep.subr.mxu1 %v163_v45  ;;  %236 = vmatprep.subr.mxu0 %v159_v46 }
  0x5d   :  { %1276 = vmatpush3.msra.mxu1 %v163_v45  ;;  %237 = vmatpush1.msra.mxu0 %v158_v47 }
  0x5e   :  { %1277 = vmatprep.subr.mxu1 %v160_v48  ;;  %271 = vmatmul.mubr.f32.vlgmr.msra.gmra.mxu0 %v1720_v49 }
  0x5f   :  { %1282 = vmatprep.subr.mxu0 %v1722_v50  ;;  %1278 = vmatpush3.msra.mxu1 %v160_v48 }
  0x60   :  { %1279 = vmatprep.mubr.f32.mxu1 %v1720_v49  ;;  %1283 = vmatpush3.msra.mxu0 %v1722_v50 }
  0x61   :  { %1280 = vmatmul.mubr.f32.vlgmr.msra.gmra.mxu1 %v1724_v51  ;;  %1284 = vmatprep.subr.mxu0 %v1728_v52 }
  0x62   :  { %276 = vmatprep.mubr.f32.mxu0 %v1613_v0  ;;  %1285 = vmatpush3.msra.mxu0 %v1728_v52 }
  0x63   :  { %1286 = vmatprep.subr.mxu0 %v1733_v53  ;;  %277 = vmatmul.mubr.f32.gmra.mxu0 %v1724_v51 }
  0x64   :  { %1287 = vmatpush3.msra.mxu0 %v1733_v53  ;;  %1314 = vmatprep.mubr.f32.mxu0 %v1720_v49 }
  0x65   :  { %1288 = vmatprep.subr.mxu0 %v1738_v54  ;;  %1317 = vmatprep.subr.mxu1 %v1796_v4 }
  0x66   :  { %1289 = vmatpush3.msra.mxu0 %v1738_v54  ;;  %1318 = vmatpush3.msra.mxu1 %v1796_v4 }
  0x67   :  { %1290 = vmatprep.subr.mxu0 %v1743_v55  ;;  %1319 = vmatprep.subr.mxu1 %v1798_v5 }
  0x68   :  { %1291 = vmatpush3.msra.mxu0 %v1743_v55  ;;  %1320 = vmatpush3.msra.mxu1 %v1798_v5 }
  0x69   :  { %1292 = vmatprep.subr.mxu0 %v1748_v56  ;;  %1321 = vmatprep.subr.mxu1 %v1802_v6 }
  0x6a   :  { %1293 = vmatpush3.msra.mxu0 %v1748_v56  ;;  %1322 = vmatpush3.msra.mxu1 %v1802_v6 }
  0x6b   :  { %1294 = vmatprep.subr.mxu0 %v1752_v57  ;;  %1323 = vmatprep.subr.mxu1 %v1806_v7 }
  0x6c   :  { %1295 = vmatpush3.msra.mxu0 %v1752_v57  ;;  %1324 = vmatpush3.msra.mxu1 %v1806_v7 }
  0x6d   :  { %1296 = vmatprep.subr.mxu0 %v1756_v58  ;;  %1325 = vmatprep.subr.mxu1 %v1810_v8 }
  0x6e   :  { %1297 = vmatpush3.msra.mxu0 %v1756_v58  ;;  %1326 = vmatpush3.msra.mxu1 %v1810_v8 }
  0x6f   :  { %1298 = vmatprep.subr.mxu0 %v1760_v59  ;;  %1327 = vmatprep.subr.mxu1 %v1814_v9 }
  0x70   :  { %1299 = vmatpush3.msra.mxu0 %v1760_v59  ;;  %1328 = vmatpush3.msra.mxu1 %v1814_v9 }
  0x71   :  { %1300 = vmatprep.subr.mxu0 %v1764_v60  ;;  %1329 = vmatprep.subr.mxu1 %v1818_v10 }
  0x72   :  { %1301 = vmatpush3.msra.mxu0 %v1764_v60  ;;  %1330 = vmatpush3.msra.mxu1 %v1818_v10 }
  0x73   :  { %1302 = vmatprep.subr.mxu0 %v1768_v61  ;;  %1331 = vmatprep.subr.mxu1 %v1822_v11 }
  0x74   :  { %1303 = vmatpush3.msra.mxu0 %v1768_v61  ;;  %1332 = vmatpush3.msra.mxu1 %v1822_v11 }
  0x75   :  { %1304 = vmatprep.subr.mxu0 %v1772_v62  ;;  %1333 = vmatprep.subr.mxu1 %v1826_v12 }
  0x76   :  { %1305 = vmatpush3.msra.mxu0 %v1772_v62  ;;  %1334 = vmatpush3.msra.mxu1 %v1826_v12 }
  0x77   :  { %1306 = vmatprep.subr.mxu0 %v1776_v63  ;;  %1335 = vmatprep.subr.mxu1 %v1830_v13 }
  0x78   :  { %1307 = vmatpush3.msra.mxu0 %v1776_v63  ;;  %1336 = vmatpush3.msra.mxu1 %v1830_v13 }
  0x79   :  { %1308 = vmatprep.subr.mxu0 %v1780_v1  ;;  %1337 = vmatprep.subr.mxu1 %v1834_v14 }
  0x7a   :  { %1309 = vmatpush3.msra.mxu0 %v1780_v1  ;;  %1338 = vmatpush3.msra.mxu1 %v1834_v14 }
  0x7b   :  { %1310 = vmatprep.subr.mxu0 %v1784_v2  ;;  %1339 = vmatprep.subr.mxu1 %v1838_v15 }
  0x7c   :  { %1311 = vmatpush3.msra.mxu0 %v1784_v2  ;;  %1340 = vmatpush3.msra.mxu1 %v1838_v15 }
  0x7d   :  { %1312 = vmatprep.subr.mxu0 %v1788_v3  ;;  %1341 = vmatprep.subr.mxu1 %v1844_v16 }
  0x7e   :  { %1313 = vmatpush3.msra.mxu0 %v1788_v3  ;;  %1342 = vmatpush3.msra.mxu1 %v1844_v16 }
  0x7f   :  { %1315 = vmatmul.mubr.f32.vlgmr.msra.gmra.mxu0 %v1724_v51  ;;  %1343 = vmatprep.subr.mxu1 %v1848_v17 }
  0x80   :  { %751 = vmatprep.mubr.f32.mxu0 %v1613_v0  ;;  %1344 = vmatpush3.msra.mxu1 %v1848_v17 }
  0x81   :  { %1345 = vmatprep.subr.mxu1 %v1852_v18 }
  0x82   :  { %1346 = vmatpush3.msra.mxu1 %v1852_v18 }
  0x83   :  { %1347 = vmatprep.subr.mxu1 %v1855_v19 }
  0x84   :  { %1348 = vmatpush3.msra.mxu1 %v1855_v19 }
 0x11e   :  { %v272_v20 = vpop.f32.mrf.mxu0 }
 0x11f   :  { %358 = vst [vmem:[#allocation2 + $0x8] sm:$0xff] %v272_v20  ;;  %v366_v20 = vld [vmem:[#allocation2 + $0x30] sm:$0xc0] }
 0x120   :  { %v274_v21 = vpop.f32.mrf.mxu0 }
 0x121   :  { %359 = vst [vmem:[#allocation2 + $0x20] sm:$0xff] %v274_v21  ;;  %v1281_v35 = vpop.f32.mrf.mxu1 }
 0x123   :  { %v278_v22 = vpop.f32.mrf.mxu0  ;;  %v349_v40 = vpop.f32.mrf.mxu1 }
 0x124   :  { %361 = vst [vmem:[#allocation2 + $0x48] sm:$0xff] %v278_v22  ;;  %v395_v48 = vrot.slane %v349_v40, 2 }
 0x125   :  { %v280_v23 = vpop.f32.mrf.mxu0 }
 0x126   :  { %362 = vst [vmem:[#allocation2 + $0x10] sm:$0xff] %v280_v23  ;;  %v365_v45 = vld [vmem:[#allocation2 + $0x8] sm:$0x3f]  ;;  %v396_v23 = vrot.slane %v1281_v35, 2  ;;  %v1873_v35 = vld [vmem:[%s2002_s12] ss:$0 sm:$0xff] }
 0x128   :  { %v369_v34 = vld [vmem:[#allocation2 + $0x20] sm:$0x7f] }
 0x129   :  { %v378_v37 = vrot.slane %v369_v34, 1 }
 0x12b   :  { %v379_v42 = vsel %vm376_vm2, %v377_v36, %v378_v37  ;;  %v388_v47 = vadd.f32 %v378_v37, %v365_v45  ;;  %v367_v21 = vld [vmem:[#allocation2 + $0x48] sm:$0x3f]  ;;  %v1131_v36 = vld [vmem:[%s1992_s2] ss:$0 sm:$0xff] }
 0x12c   :  { %v387_v46 = vadd.f32 %v379_v42, %v364_v41 }
 0x12d   :  { %v371_v39 = vld [vmem:[#allocation2 + $0x10] sm:$0x7f] }
 0x12e   :  { %v381_v44 = vrot.slane %v371_v39, 1 }
 0x130   :  { %v382_v22 = vsel %vm376_vm2, %v380_v43, %v381_v44 }
 0x13f   :  { %v1316_v25 = vpop.f32.mrf.mxu0 }
 0x140   :  { %v503_v26 = vadd.f32 %v1316_v25, %v1863_v24  ;;  %v399_v25 = vadd.f32 %v395_v48, %v387_v46 }
 0x141   :  { %v497_v27 = vpop.f32.mrf.mxu0 }
 0x142   :  { %v498_v28 = vadd.f32 %v1863_v24, %v497_v27  ;;  %v509_v29 = vmul.f32 0.01, %v503_v26  ;;  %vm507_vm0 = vcmp.gt.f32.partialorder %v503_v26, 0.0  ;;  %v389_v27 = vadd.f32 %v382_v22, %v366_v20  ;;  %v682_v20 = vld [vmem:[#allocation8 + $0x158] sm:$0xff]  ;;  %v679_v22 = vld [vmem:[#allocation8 + $0x140] sm:$0xff] }
 0x144   :  { %v508_v30 = vmul.f32 0.01, %v498_v28  ;;  %vm506_vm1 = vcmp.gt.f32.partialorder %v498_v28, 0.0  ;;  %v511_v32 = vsel %vm507_vm0, %v503_v26, %v509_v29  ;;  %v400_v26 = vadd.f32 %v395_v48, %v388_v47  ;;  %v685_v47 = vld [vmem:[#allocation8 + $0x170] sm:$0xff]  ;;  %v684_v48 = vld [vmem:[#allocation8 + $0x168] sm:$0xff] }
 0x145   :  { %v408_v29 = vrot.slane %v399_v25, 6  ;;  %687 = vmatprep.subr.mxu0 %v685_v47  ;;  %v678_v25 = vld [vmem:[#allocation8 + $0x138] sm:$0xff]  ;;  %v677_v47 = vld [vmem:[#allocation8 + $0x130] sm:$0xff] }
 0x146   :  { %v510_v31 = vsel %vm506_vm1, %v498_v28, %v508_v30  ;;  %v390_v28 = vadd.f32 %v381_v44, %v367_v21  ;;  %v409_v30 = vrot.slane %v400_v26, 6  ;;  %v681_v21 = vld [vmem:[#allocation8 + $0x150] sm:$0xff]  ;;  %688 = vmatpush1.msra.mxu0 %v684_v48  ;;  %v676_v26 = vld [vmem:[#allocation8 + $0x128] sm:$0xff]  ;;  %v667_v48 = vld [vmem:[#allocation8 + $0xe0] sm:$0xff] }
 0x147   :  { %1349 = vmatprep.mubr.f32.mxu1 %v510_v31  ;;  %v401_v31 = vadd.f32 %v396_v23, %v389_v27  ;;  %689 = vmatprep.subr.mxu0 %v682_v20  ;;  %v115_v27 = vlaneseq  ;;  %v666_v20 = vld [vmem:[#allocation8 + $0xd8] sm:$0xff] }
 0x148   :  { %1350 = vmatmul.mubr.f32.vlgmr.msra.gmra.mxu1 %v511_v32  ;;  %v402_v32 = vadd.f32 %v396_v23, %v390_v28  ;;  %v410_v34 = vsel %vm407_vm3, %v408_v29, %v409_v30  ;;  %v686_v23 = vld [vmem:[#allocation8 + $0x178] sm:$0xff]  ;;  %690 = vmatpush1.msra.mxu0 %v681_v21 }
 0x149   :  { %v411_v37 = vrot.slane %v401_v31, 6  ;;  %v423_v41 = vadd.f32 %v1131_v36, %v410_v34  ;;  %1352 = vmatprep.subr.mxu1 %v686_v23  ;;  %691 = vmatprep.subr.mxu0 %v679_v22  ;;  %v1877_v28 = vand.u32 127, %v115_v27  ;;  %v674_v21 = vld [vmem:[#allocation8 + $0x118] sm:$0xff]  ;;  %v664_v22 = vld [vmem:[#allocation8 + $0xc8] sm:$0xff] }
 0x14a   :  { %v412_v38 = vrot.slane %v402_v32, 6  ;;  %1353 = vmatpush3.msra.mxu1 %v686_v23  ;;  %692 = vmatpush1.msra.mxu0 %v678_v25  ;;  %v663_v23 = vld [vmem:[#allocation8 + $0xc0] sm:$0xff]  ;;  %v660_v27 = vld [vmem:[#allocation8 + $0xa8] sm:$0xff] }
 0x14b   :  { %693 = vmatprep.subr.mxu0 %v676_v26  ;;  %vm117_vm4 = vcmp.lt.s32.totalorder %v1877_v28, 32  ;;  %v671_v25 = vld [vmem:[#allocation8 + $0x100] sm:$0xff]  ;;  %v661_v26 = vld [vmem:[#allocation8 + $0xb0] sm:$0xff] }
 0x14c   :  { %v413_v42 = vsel %vm407_vm3, %v411_v37, %v412_v38  ;;  %v1138_v28 = vld [vmem:[%s1998_s8] ss:$0 sm:$0xff] }
 0x14d   :  { %v424_v45 = vadd.f32 %v1131_v36, %v413_v42  ;;  %v673_v42 = vld [vmem:[#allocation8 + $0x110] sm:$0xff] }
 0x208   :  { %v1351_v33 = vpop.f32.mrf.mxu1 }
 0x209   :  { %v590_v43 = vadd.f32 %v1351_v33, %v1873_v35 }
 0x20a   :  { %v584_v39 = vpop.f32.mrf.mxu1 }
 0x20b   :  { %v585_v40 = vadd.f32 %v1873_v35, %v584_v39  ;;  %v594_v46 = vadd.f32 %v590_v43, %v424_v45  ;;  %v672_v43 = vld [vmem:[#allocation8 + $0x108] sm:$0xff]  ;;  %v670_v45 = vld [vmem:[#allocation8 + $0xf8] sm:$0xff] }
 0x20d   :  { %v593_v44 = vadd.f32 %v585_v40, %v423_v41  ;;  %v675_v40 = vld [vmem:[#allocation8 + $0x120] sm:$0xff] }
 0x20e   :  { %v683_v41 = vld [vmem:[#allocation8 + $0x160] sm:$0xff]  ;;  %694 = vmatpush1.msra.mxu0 %v675_v40 }
 0x20f   :  { %597 = vadd.xlane.f32.xlu0 %v593_v44  ;;  %1354 = vmatprep.subr.mxu1 %v683_v41  ;;  %v651_v40 = vld [vmem:[#allocation8 + $0x60] sm:$0xff] }
 0x210   :  { %695 = vmatprep.subr.mxu0 %v673_v42  ;;  %1355 = vmatpush3.msra.mxu1 %v683_v41  ;;  %v659_v41 = vld [vmem:[#allocation8 + $0xa0] sm:$0xff]  ;;  %v649_v42 = vld [vmem:[#allocation8 + $0x50] sm:$0xff] }
 0x211   :  { %696 = vmatpush1.msra.mxu0 %v672_v43  ;;  %v648_v43 = vld [vmem:[#allocation8 + $0x48] sm:$0xff] }
 0x212   :  { %697 = vmatprep.subr.mxu0 %v670_v45  ;;  %v646_v45 = vld [vmem:[#allocation8 + $0x38] sm:$0xff] }
 0x213   :  { %599 = vadd.xlane.f32.xlu0 %v594_v46 }
 0x298   :  { %v598_v29 = vpop.xlane.xlu0 %597 }
 0x299   :  { %v601_v30 = vmul.f32 0.03125, %v598_v29  ;;  %v668_v29 = vld [vmem:[#allocation8 + $0xe8] sm:$0xff] }
 0x29b   :  { %v603_v31 = vsub.f32 %v593_v44, %v601_v30  ;;  %v680_v44 = vld [vmem:[#allocation8 + $0x148] sm:$0xff]  ;;  %v658_v30 = vld [vmem:[#allocation8 + $0x98] sm:$0xff] }
 0x29c   :  { %v600_v32 = vpop.xlane.xlu0 %599  ;;  %1356 = vmatprep.subr.mxu1 %v680_v44 }
 0x29d   :  { %v602_v33 = vmul.f32 0.03125, %v600_v32  ;;  %v1882_v34 = vsel %vm117_vm4, %v603_v31, 0.0  ;;  %1357 = vmatpush3.msra.mxu1 %v680_v44  ;;  %v657_v31 = vld [vmem:[#allocation8 + $0x90] sm:$0xff]  ;;  %v656_v44 = vld [vmem:[#allocation8 + $0x88] sm:$0xff] }
 0x29e   :  { %v607_v36 = vmul.f32 %v1882_v34, %v1882_v34  ;;  %1358 = vmatprep.subr.mxu1 %v677_v47  ;;  %v665_v32 = vld [vmem:[#allocation8 + $0xd0] sm:$0xff] }
 0x29f   :  { %v604_v37 = vsub.f32 %v594_v46, %v602_v33  ;;  %v669_v46 = vld [vmem:[#allocation8 + $0xf0] sm:$0xff]  ;;  %1359 = vmatpush3.msra.mxu1 %v677_v47  ;;  %v655_v33 = vld [vmem:[#allocation8 + $0x80] sm:$0xff] }
 0x2a0   :  { %609 = vadd.xlane.f32.xlu1 %v607_v36  ;;  %698 = vmatpush1.msra.mxu0 %v669_v46  ;;  %v654_v36 = vld [vmem:[#allocation8 + $0x78] sm:$0xff]  ;;  %v645_v46 = vld [vmem:[#allocation8 + $0x30] sm:$0xff] }
 0x2a1   :  { %v1888_v38 = vsel %vm117_vm4, %v604_v37, 0.0  ;;  %699 = vmatprep.subr.mxu0 %v667_v48  ;;  %1360 = vmatprep.subr.mxu1 %v674_v21  ;;  %v662_v37 = vld [vmem:[#allocation8 + $0xb8] sm:$0xff]  ;;  %v653_v47 = vld [vmem:[#allocation8 + $0x70] sm:$0xff]  ;;  %v643_v48 = vld [vmem:[#allocation8 + $0x20] sm:$0xff] }
 0x2a2   :  { %v608_v39 = vmul.f32 %v1888_v38, %v1888_v38  ;;  %700 = vmatpush1.msra.mxu0 %v666_v20  ;;  %1361 = vmatpush3.msra.mxu1 %v674_v21  ;;  %v642_v20 = vld [vmem:[#allocation8 + $0x18] sm:$0xff] }
 0x2a3   :  { %701 = vmatprep.subr.mxu0 %v664_v22  ;;  %1362 = vmatprep.subr.mxu1 %v671_v25  ;;  %v650_v21 = vld [vmem:[#allocation8 + $0x58] sm:$0xff]  ;;  %v640_v22 = vld [vmem:[#allocation8 + $0x8] sm:$0xff] }
 0x2a4   :  { %611 = vadd.xlane.f32.xlu1 %v608_v39  ;;  %702 = vmatpush1.msra.mxu0 %v663_v23  ;;  %v652_v39 = vld [vmem:[#allocation8 + $0x68] sm:$0xff]  ;;  %v639_v23 = vld [vmem:[#allocation8] sm:$0xff] }
 0x2a5   :  { %703 = vmatprep.subr.mxu0 %v661_v26  ;;  %1363 = vmatpush3.msra.mxu1 %v671_v25  ;;  %v647_v25 = vld [vmem:[#allocation8 + $0x40] sm:$0xff]  ;;  %v644_v26 = vld [vmem:[#allocation8 + $0x28] sm:$0xff] }
 0x2a6   :  { %704 = vmatpush1.msra.mxu0 %v660_v27  ;;  %1364 = vmatprep.subr.mxu1 %v668_v29  ;;  %v641_v27 = vld [vmem:[#allocation8 + $0x10] sm:$0xff] }
 0x2a7   :  { %705 = vmatprep.subr.mxu0 %v658_v30  ;;  %1365 = vmatpush3.msra.mxu1 %v668_v29 }
 0x2a8   :  { %706 = vmatpush1.msra.mxu0 %v657_v31  ;;  %1366 = vmatprep.subr.mxu1 %v665_v32 }
 0x2a9   :  { %707 = vmatprep.subr.mxu0 %v655_v33  ;;  %1367 = vmatpush3.msra.mxu1 %v665_v32 }
 0x2aa   :  { %708 = vmatpush1.msra.mxu0 %v654_v36  ;;  %1368 = vmatprep.subr.mxu1 %v662_v37 }
 0x2ab   :  { %709 = vmatprep.subr.mxu0 %v652_v39  ;;  %1369 = vmatpush3.msra.mxu1 %v662_v37  ;;  %v1134_v39 = vld [vmem:[%s1993_s3] ss:$0 sm:$0xff] }
 0x2ac   :  { %710 = vmatpush1.msra.mxu0 %v651_v40  ;;  %1370 = vmatprep.subr.mxu1 %v659_v41 }
 0x2ad   :  { %711 = vmatprep.subr.mxu0 %v649_v42  ;;  %1371 = vmatpush3.msra.mxu1 %v659_v41  ;;  %v1135_v41 = vld [vmem:[%s1994_s4] ss:$0 sm:$0xff] }
 0x2ae   :  { %712 = vmatpush1.msra.mxu0 %v648_v43  ;;  %1372 = vmatprep.subr.mxu1 %v656_v44 }
 0x2af   :  { %713 = vmatprep.subr.mxu0 %v646_v45  ;;  %1373 = vmatpush3.msra.mxu1 %v656_v44 }
 0x2b0   :  { %714 = vmatpush1.msra.mxu0 %v645_v46  ;;  %1374 = vmatprep.subr.mxu1 %v653_v47 }
 0x2b1   :  { %715 = vmatprep.subr.mxu0 %v643_v48  ;;  %1375 = vmatpush3.msra.mxu1 %v653_v47 }
 0x2b2   :  { %716 = vmatpush1.msra.mxu0 %v642_v20  ;;  %1376 = vmatprep.subr.mxu1 %v650_v21 }
 0x2b3   :  { %717 = vmatprep.subr.mxu0 %v640_v22  ;;  %1377 = vmatpush3.msra.mxu1 %v650_v21 }
 0x2b4   :  { %718 = vmatpush1.msra.mxu0 %v639_v23  ;;  %1378 = vmatprep.subr.mxu1 %v647_v25 }
 0x2b5   :  { %1379 = vmatpush3.msra.mxu1 %v647_v25  ;;  %1387 = vmatprep.subr.mxu0 %v1722_v50 }
 0x2b6   :  { %1380 = vmatprep.subr.mxu1 %v644_v26 }
 0x2b7   :  { %1381 = vmatpush3.msra.mxu1 %v644_v26 }
 0x2b8   :  { %1382 = vmatprep.subr.mxu1 %v641_v27 }
 0x2b9   :  { %1383 = vmatpush3.msra.mxu1 %v641_v27 }
 0x2ba   :  { %1422 = vmatprep.subr.mxu1 %v1796_v4 }
 0x329   :  { %v610_v29 = vpop.xlane.xlu1 %609 }
 0x32a   :  { %v613_v30 = vmul.f32 0.03125, %v610_v29 }
 0x32c   :  { %v615_v31 = vadd.f32 1e-08, %v613_v30 }
 0x32d   :  { %v612_v32 = vpop.xlane.xlu1 %611 }
 0x32e   :  { %1468 = vrsqrt.f32 %v615_v31  ;;  %v614_v33 = vmul.f32 0.03125, %v612_v32  ;;  %v1136_v31 = vld [vmem:[%s1996_s6] ss:$0 sm:$0xff] }
 0x330   :  { %v616_v36 = vadd.f32 1e-08, %v614_v33 }
 0x332   :  { %1470 = vrsqrt.f32 %v616_v36 }
 0x33b   :  { %v1469_v37 = vpop.eup %1468 }
 0x33c   :  { %v619_v40 = vmul.f32 %v1469_v37, %v1882_v34 }
 0x33e   :  { %v627_v42 = vmul.f32 %v1134_v39, %v619_v40 }
 0x33f   :  { %v1471_v43 = vpop.eup %1470 }
 0x340   :  { %v635_v44 = vadd.f32 %v1135_v41, %v627_v42  ;;  %v620_v45 = vmul.f32 %v1471_v43, %v1888_v38 }
 0x342   :  { %v637_v46 = vmax.f32 %v635_v44, 0.0  ;;  %v628_v47 = vmul.f32 %v1134_v39, %v620_v45 }
 0x344   :  { %752 = vmatmul.mubr.f32.vlgmr.msra.gmra.mxu0 %v637_v46  ;;  %1384 = vmatprep.mubr.f32.mxu1 %v637_v46  ;;  %v636_v48 = vadd.f32 %v1135_v41, %v628_v47 }
 0x345   :  { %1388 = vmatpush3.msra.mxu0 %v1722_v50  ;;  %757 = vmatprep.mubr.f32.mxu0 %v1613_v0 }
 0x346   :  { %1389 = vmatprep.subr.mxu0 %v1728_v52  ;;  %v638_v34 = vmax.f32 %v636_v48, 0.0 }
 0x347   :  { %1390 = vmatpush3.msra.mxu0 %v1728_v52 }
 0x348   :  { %1391 = vmatprep.subr.mxu0 %v1733_v53  ;;  %758 = vmatmul.mubr.f32.gmra.mxu0 %v638_v34 }
 0x349   :  { %1385 = vmatmul.mubr.f32.vlgmr.msra.gmra.mxu1 %v638_v34  ;;  %1392 = vmatpush3.msra.mxu0 %v1733_v53 }
 0x34a   :  { %1393 = vmatprep.subr.mxu0 %v1738_v54  ;;  %1419 = vmatprep.mubr.f32.mxu0 %v637_v46 }
 0x34b   :  { %1394 = vmatpush3.msra.mxu0 %v1738_v54  ;;  %1423 = vmatpush3.msra.mxu1 %v1796_v4 }
 0x34c   :  { %1395 = vmatprep.subr.mxu0 %v1743_v55  ;;  %1424 = vmatprep.subr.mxu1 %v1798_v5 }
 0x34d   :  { %1396 = vmatpush3.msra.mxu0 %v1743_v55  ;;  %1425 = vmatpush3.msra.mxu1 %v1798_v5 }
 0x34e   :  { %1397 = vmatprep.subr.mxu0 %v1748_v56  ;;  %1426 = vmatprep.subr.mxu1 %v1802_v6 }
 0x34f   :  { %1398 = vmatpush3.msra.mxu0 %v1748_v56  ;;  %1427 = vmatpush3.msra.mxu1 %v1802_v6 }
 0x350   :  { %1399 = vmatprep.subr.mxu0 %v1752_v57  ;;  %1428 = vmatprep.subr.mxu1 %v1806_v7 }
 0x351   :  { %1400 = vmatpush3.msra.mxu0 %v1752_v57  ;;  %1429 = vmatpush3.msra.mxu1 %v1806_v7 }
 0x352   :  { %1401 = vmatprep.subr.mxu0 %v1756_v58  ;;  %1430 = vmatprep.subr.mxu1 %v1810_v8 }
 0x353   :  { %1402 = vmatpush3.msra.mxu0 %v1756_v58  ;;  %1431 = vmatpush3.msra.mxu1 %v1810_v8 }
 0x354   :  { %1403 = vmatprep.subr.mxu0 %v1760_v59  ;;  %1432 = vmatprep.subr.mxu1 %v1814_v9 }
 0x355   :  { %1404 = vmatpush3.msra.mxu0 %v1760_v59  ;;  %1433 = vmatpush3.msra.mxu1 %v1814_v9  ;;  %v847_v9 = vld [vmem:[#allocation2 + $0x30] sm:$0xf0] }
 0x356   :  { %1405 = vmatprep.subr.mxu0 %v1764_v60  ;;  %1434 = vmatprep.subr.mxu1 %v1818_v10 }
 0x357   :  { %1406 = vmatpush3.msra.mxu0 %v1764_v60  ;;  %1435 = vmatpush3.msra.mxu1 %v1818_v10 }
 0x358   :  { %1407 = vmatprep.subr.mxu0 %v1768_v61  ;;  %1436 = vmatprep.subr.mxu1 %v1822_v11 }
 0x359   :  { %1408 = vmatpush3.msra.mxu0 %v1768_v61  ;;  %1437 = vmatpush3.msra.mxu1 %v1822_v11 }
 0x35a   :  { %1409 = vmatprep.subr.mxu0 %v1772_v62  ;;  %1438 = vmatprep.subr.mxu1 %v1826_v12 }
 0x35b   :  { %1410 = vmatpush3.msra.mxu0 %v1772_v62  ;;  %1439 = vmatpush3.msra.mxu1 %v1826_v12  ;;  %v845_v12 = vld [vmem:[#allocation2 + $0x18] sm:$0xf0] }
 0x35c   :  { %1411 = vmatprep.subr.mxu0 %v1776_v63  ;;  %1440 = vmatprep.subr.mxu1 %v1830_v13 }
 0x35d   :  { %1412 = vmatpush3.msra.mxu0 %v1776_v63  ;;  %1441 = vmatpush3.msra.mxu1 %v1830_v13 }
 0x35e   :  { %1413 = vmatprep.subr.mxu0 %v1780_v1  ;;  %1442 = vmatprep.subr.mxu1 %v1834_v14 }
 0x35f   :  { %1414 = vmatpush3.msra.mxu0 %v1780_v1  ;;  %1443 = vmatpush3.msra.mxu1 %v1834_v14  ;;  %v851_v1 = vld [vmem:[#allocation2 + $0x50] sm:$0xc0] }
 0x360   :  { %1415 = vmatprep.subr.mxu0 %v1784_v2  ;;  %1444 = vmatprep.subr.mxu1 %v1838_v15  ;;  %v861_v5 = vrot.slane %v851_v1, 2 }
 0x361   :  { %1416 = vmatpush3.msra.mxu0 %v1784_v2  ;;  %1445 = vmatpush3.msra.mxu1 %v1838_v15 }
 0x362   :  { %1417 = vmatprep.subr.mxu0 %v1788_v3  ;;  %1446 = vmatprep.subr.mxu1 %v1844_v16 }
 0x363   :  { %1418 = vmatpush3.msra.mxu0 %v1788_v3  ;;  %1447 = vmatpush3.msra.mxu1 %v1844_v16  ;;  %v849_v3 = vld [vmem:[#allocation2] sm:$0xc0] }
 0x364   :  { %1420 = vmatmul.mubr.f32.vlgmr.msra.gmra.mxu0 %v638_v34  ;;  %1448 = vmatprep.subr.mxu1 %v1848_v17  ;;  %v858_v7 = vrot.slane %v849_v3, 2 }
 0x365   :  { %1449 = vmatpush3.msra.mxu1 %v1848_v17 }
 0x366   :  { %1450 = vmatprep.subr.mxu1 %v1852_v18 }
 0x367   :  { %1451 = vmatpush3.msra.mxu1 %v1852_v18 }
 0x368   :  { %1452 = vmatprep.subr.mxu1 %v1855_v19 }
 0x369   :  { %1453 = vmatpush3.msra.mxu1 %v1855_v19 }
 0x404   :  { %v753_v0 = vpop.f32.mrf.mxu0 }
 0x405   :  { %839 = vst [vmem:[#allocation2 + $0x8] sm:$0xff] %v753_v0 }
 0x406   :  { %v755_v50 = vpop.f32.mrf.mxu0 }
 0x407   :  { %840 = vst [vmem:[#allocation2 + $0x20] sm:$0xff] %v755_v50 }
 0x408   :  { %v759_v52 = vpop.f32.mrf.mxu0 }
 0x409   :  { %842 = vst [vmem:[#allocation2 + $0x48] sm:$0xff] %v759_v52  ;;  %v1386_v53 = vpop.f32.mrf.mxu1 }
 0x40a   :  { %v761_v54 = vpop.f32.mrf.mxu0  ;;  %v877_v17 = vrot.slane %v1386_v53, 4 }
 0x40b   :  { %843 = vst [vmem:[#allocation2 + $0x10] sm:$0xff] %v761_v54  ;;  %v830_v55 = vpop.f32.mrf.mxu1 }
 0x40c   :  { %v846_v16 = vld [vmem:[#allocation2 + $0x8] sm:$0xf]  ;;  %v876_v20 = vrot.slane %v830_v55, 4 }
 0x40e   :  { %v850_v4 = vld [vmem:[#allocation2 + $0x20] sm:$0x3f] }
 0x40f   :  { %v859_v8 = vrot.slane %v850_v4, 2 }
 0x410   :  { %v848_v11 = vld [vmem:[#allocation2 + $0x48] sm:$0xf] }
 0x411   :  { %v860_v13 = vsel %vm857_vm7, %v858_v7, %v859_v8  ;;  %v869_v19 = vadd.f32 %v859_v8, %v846_v16 }
 0x412   :  { %v852_v2 = vld [vmem:[#allocation2 + $0x10] sm:$0x3f]  ;;  %v868_v18 = vadd.f32 %v860_v13, %v845_v12 }
 0x413   :  { %v862_v6 = vrot.slane %v852_v2, 2  ;;  %v881_v22 = vadd.f32 %v876_v20, %v869_v19 }
 0x414   :  { %v880_v21 = vadd.f32 %v876_v20, %v868_v18 }
 0x415   :  { %v863_v10 = vsel %vm857_vm7, %v861_v5, %v862_v6  ;;  %v871_v15 = vadd.f32 %v862_v6, %v848_v11  ;;  %v890_v27 = vrot.slane %v881_v22, 4 }
 0x416   :  { %v870_v14 = vadd.f32 %v863_v10, %v847_v9  ;;  %v889_v26 = vrot.slane %v880_v21, 4 }
 0x417   :  { %v883_v38 = vadd.f32 %v877_v17, %v871_v15 }
 0x418   :  { %v891_v32 = vsel %vm888_vm8, %v889_v26, %v890_v27 }
 0x419   :  { %v893_v25 = vrot.slane %v883_v38, 4  ;;  %v904_v41 = vadd.f32 %v1136_v31, %v891_v32 }
 0x424   :  { %v1421_v56 = vpop.f32.mrf.mxu0 }
 0x425   :  { %v978_v57 = vadd.f32 %v1421_v56, %v1863_v24 }
 0x426   :  { %v972_v58 = vpop.f32.mrf.mxu0 }
 0x427   :  { %v973_v59 = vadd.f32 %v1863_v24, %v972_v58  ;;  %v984_v60 = vmul.f32 0.01, %v978_v57  ;;  %vm982_vm5 = vcmp.gt.f32.partialorder %v978_v57, 0.0  ;;  %v882_v24 = vadd.f32 %v877_v17, %v870_v14 }
 0x429   :  { %v983_v61 = vmul.f32 0.01, %v973_v59  ;;  %vm981_vm6 = vcmp.gt.f32.partialorder %v973_v59, 0.0  ;;  %v986_v63 = vsel %vm982_vm5, %v978_v57, %v984_v60  ;;  %v892_v23 = vrot.slane %v882_v24, 4 }
 0x42b   :  { %v985_v62 = vsel %vm981_vm6, %v973_v59, %v983_v61  ;;  %v894_v29 = vsel %vm888_vm8, %v892_v23, %v893_v25  ;;  %v1137_v59 = vld [vmem:[%s1997_s7] ss:$0 sm:$0xff]  ;;  %s1576_s7 = scalar_lea.vmem %s1118_s27, 256 }
 0x42c   :  { %1454 = vmatprep.mubr.f32.mxu1 %v985_v62  ;;  %v905_v36 = vadd.f32 %v1136_v31, %v894_v29  ;;  %p1577_p11 = scmp.ne.s32.totalorder %s1118_s27, %s1576_s7  ;;  %p1582_p13 = scmp.lt.s32.totalorder %s1576_s7, %s1576_s7 }
 0x42d   :  { %1455 = vmatmul.mubr.f32.vlgmr.msra.gmra.mxu1 %v986_v63 }
 0x42e   :  { %p1583_p0 = por %p1582_p13, %p1581_p12 }
 0x430   :  { %p1584_p1 = pnand %p1583_p0, %p1577_p11 }
 0x4ed   :  { %v1456_v30 = vpop.f32.mrf.mxu1 }
 0x4ee   :  { %v1059_v33 = vadd.f32 %v1456_v30, %v1873_v35 }
 0x4ef   :  { %v1053_v37 = vpop.f32.mrf.mxu1 }
 0x4f0   :  { %v1054_v39 = vadd.f32 %v1873_v35, %v1053_v37  ;;  %v1063_v40 = vadd.f32 %v1059_v33, %v905_v36 }
 0x4f2   :  { %1068 = vadd.xlane.f32.xlu1 %v1063_v40  ;;  %v1062_v42 = vadd.f32 %v1054_v39, %v904_v41 }
 0x4f4   :  { %1066 = vadd.xlane.f32.xlu0 %v1062_v42 }
 0x57b   :  { %v1069_v43 = vpop.xlane.xlu1 %1068 }
 0x57c   :  { %v1071_v44 = vmul.f32 0.03125, %v1069_v43 }
 0x57d   :  { %v1067_v45 = vpop.xlane.xlu0 %1066 }
 0x57e   :  { %v1073_v46 = vsub.f32 %v1063_v40, %v1071_v44  ;;  %v1070_v47 = vmul.f32 0.03125, %v1067_v45 }
 0x580   :  { %v1072_v48 = vsub.f32 %v1062_v42, %v1070_v47  ;;  %v1075_v34 = vsel %vm117_vm4, %v1073_v46, 0.0 }
 0x581   :  { %v1077_v0 = vmul.f32 %v1075_v34, %v1075_v34 }
 0x582   :  { %v1074_v50 = vsel %vm117_vm4, %v1072_v48, 0.0 }
 0x583   :  { %1080 = vadd.xlane.f32.xlu1 %v1077_v0  ;;  %v1076_v35 = vmul.f32 %v1074_v50, %v1074_v50 }
 0x585   :  { %1078 = vadd.xlane.f32.xlu0 %v1076_v35 }
 0x60c   :  { %v1081_v52 = vpop.xlane.xlu1 %1080 }
 0x60d   :  { %v1083_v53 = vmul.f32 0.03125, %v1081_v52 }
 0x60e   :  { %v1079_v54 = vpop.xlane.xlu0 %1078 }
 0x60f   :  { %v1085_v55 = vadd.f32 1e-08, %v1083_v53  ;;  %v1082_v56 = vmul.f32 0.03125, %v1079_v54 }
 0x611   :  { %1472 = vrsqrt.f32 %v1085_v55  ;;  %v1084_v57 = vadd.f32 1e-08, %v1082_v56 }
 0x613   :  { %1474 = vrsqrt.f32 %v1084_v57 }
 0x61e   :  { %v1473_v58 = vpop.eup %1472 }
 0x61f   :  { %v1089_v60 = vmul.f32 %v1473_v58, %v1075_v34 }
 0x620   :  { %v1475_v61 = vpop.eup %1474 }
 0x621   :  { %v1088_v62 = vmul.f32 %v1475_v61, %v1074_v50  ;;  %v1097_v63 = vmul.f32 %v1137_v59, %v1089_v60 }
 0x623   :  { %v1096_v1 = vmul.f32 %v1137_v59, %v1088_v62  ;;  %v1105_v2 = vadd.f32 %v1138_v28, %v1097_v63 }
 0x625   :  { %v1104_v3 = vadd.f32 %v1138_v28, %v1096_v1  ;;  %v1107_v4 = vmax.f32 %v1105_v2, 0.0 }
 0x627   :  { %v1106_v5 = vmax.f32 %v1104_v3, 0.0  ;;  %v1109_v6 = vadd.f32 %v1107_v4, %v1724_v51 }
 0x629   :  { %v1108_v7 = vadd.f32 %v1106_v5, %v1720_v49  ;;  %1111 = vst [vmem:[#allocation12 + $0x8] sm:$0xff] %v1109_v6 }
 0x62b   :  { %1110 = vst [vmem:[#allocation12] sm:$0xff] %v1108_v7 }
 0x62c   :  { %1587 = shalt.err (!%p1584_p1)
}
 0x62d   :  { %1123 = dma.vmem_to_hbm [thread:$0]  %s1118_s27, 256, %s2003_s13, [#allocation5], %s1609_s20, %s1609_s20, %s1610_s21  }
 0x62e   :  { %1602 = dma.done.wait [#allocation5], 256  }
 0x62f   :  { %1603 = vsyncadd [#allocation5], 4294967040 }
 0x630   :  { %1127 = vsyncpa [#allocation4], 1 }
 0x631   :  { %1128 = vsyncpa [#allocation7], 1 }
 0x632   :  { %1129 = vsyncpa [#allocation10], 1 }
 0x633   :  { %1130 = vsyncpa [#allocation5], 1 }

</bundles_post_ra>
